<compile_context>
chip_gen: v7x
topology: tpu7x:2x2x1
jax: 0.10.0
libtpu: 0.0.40
codegen_flags: <defaults>
</compile_context>

<pallas_src>
import functools

import jax
import jax.numpy as jnp
import numpy as np
from jax.experimental import pallas as pl
from jax.experimental.pallas import tpu as pltpu


# ----------------------------- Pallas kernel -------------------------------
def cfc_kernel(x_ref, wmm_ref, ws_ref, out_ref, *, H, U, SO):
    S, B, F = x_ref.shape
    W3 = 3 * H                      # fused head width: ff1 | ff2 | (time_a+time_b)
    NRED = S * B + B + 1            # fused reduce-matrix contraction length

    # ---- unpack the packed weight buffers with static, aligned ref slices --
    wbx = wmm_ref[0:F, 0:U]                       # (F, U)   backbone, x part
    wbh = wmm_ref[8:8 + H, 0:U]                   # (H, U)   backbone, h part
    whd = wmm_ref[8 + H:8 + H + U, 0:W3]          # (U, 3H)  fused head projections
    bb = ws_ref[0:1, 0:U]                         # (1, U)   backbone bias
    bh = ws_ref[1:2, 0:W3]                        # (1, 3H)  fused head bias
    bfc = ws_ref[2:3, 0:3]                        # (1, 3)   fc bias
    wfc = ws_ref[8:8 + H, 0:3]                    # (H, 3)   fc weight
    wred = ws_ref[8 + H:8 + H + B * SO, 0:NRED]   # (B*SO, NRED) fused reduce matrix

    # ---- per-sequence mean removal ------------------------------------------
    x = x_ref[...]                                # (S, B, F) time-major
    mean = jnp.mean(x, axis=0)                    # (B, F)
    xc = (x - mean[None, :, :]).reshape(S * B, F)          # rows ordered (t, b)

    # ---- hoisted x-part of the backbone matmul (one MXU push) ---------------
    zx = jnp.dot(xc, wbx, preferred_element_type=jnp.float32) + bb   # (S*B, U)

    # hoisted bias broadcast (JAX does not CSE broadcast_in_dim per unrolled step)
    bh_b = jnp.broadcast_to(bh, (B, W3))

    # ---- serial CfC recurrence: 2 matmuls per step on the critical chain ----
    h = jnp.zeros((B, H), jnp.float32)
    hs = []
    for t in range(S):              # S is small & static: fully unrolled
        zt = zx[t * B:(t + 1) * B, :]                     # static 2-D row slice
        z = zt + jnp.dot(h, wbh, preferred_element_type=jnp.float32)
        g = 1.7159 * jnp.tanh(0.666 * z)                  # LeCun activation
        head = jnp.dot(g, whd, preferred_element_type=jnp.float32) + bh_b  # (B, 3H)
        ff1 = jnp.tanh(head[:, 0:H])
        ff2 = jnp.tanh(head[:, H:2 * H])
        ti = jax.nn.sigmoid(head[:, 2 * H:3 * H])         # ts == 1 pre-folded
        h = ff1 * (1.0 - ti) + ti * ff2                   # Dropout(0.3) == id (eval)
        hs.append(h)

    # ---- epilogue (off the serial chain): fc head + fused fc_reduce ---------
    hcat = jnp.concatenate(hs, axis=0)                                # (S*B, H)
    r = jnp.dot(hcat, wfc, preferred_element_type=jnp.float32) + bfc  # (S*B, 3)
    raug = jnp.concatenate(
        [r, mean[:, 0:3], jnp.ones((1, 3), jnp.float32)], axis=0)     # (NRED, 3)
    # wred folds fc_reduce weight, the sequence-mean add-back and the
    # fc_reduce bias into a single small matmul; single lane-dense store.
    out_ref[...] = jnp.dot(wred, raug, preferred_element_type=jnp.float32)  # (B*SO, 3)


# ------------------------------- wrapper ------------------------------------
def _pad2(a, rows, cols):
    a = a.astype(jnp.float32)
    return jnp.pad(a, ((0, rows - a.shape[0]), (0, cols - a.shape[1])))


def cfc_forward(x, params, *, hidden_size, seq_out_len):
    """x: (B, 1, F, S) float32 -> (B, seq_out_len, 3) float32."""
    B, _, F, S = x.shape
    H = hidden_size
    U = params["wbx"].shape[1]
    SO = seq_out_len
    assert F >= 3, "model adds the per-sequence mean of features 0:3 back to the output"

    W3 = 3 * H
    NRED = S * B + B + 1
    CPAD = max(U, W3, NRED)

    # glue: (B, 1, F, S) -> time-major (S, B, F)
    x_sbf = jnp.transpose(jnp.squeeze(x, axis=1), (2, 0, 1)).astype(jnp.float32)

    # NOTE: in deployment the packed weight buffers below would be built once
    # at weight-load time; here they are rebuilt per call as cheap glue.

    # packed matmul weights: rows [0:8)=wbx (F rows used), [8:8+H)=wbh,
    # [8+H:8+H+U)=fused head (ff1 | ff2 | wta+wtb, since ts == 1).
    whead = jnp.concatenate(
        [params["wf1"], params["wf2"], params["wta"] + params["wtb"]], axis=1)  # (U, 3H)
    wmm = jnp.concatenate([
        _pad2(params["wbx"], 8, CPAD),
        _pad2(params["wbh"], H, CPAD),
        _pad2(whead, U, CPAD),
    ], axis=0)                                                       # (8+H+U, CPAD)

    # packed smalls: biases, fc weight and the fused reduce matrix.
    bh = jnp.concatenate(
        [params["bf1"], params["bf2"], params["bta"] + params["btb"]], axis=1)  # (1, 3H)
    wrd = params["wrd"].astype(jnp.float32)                          # (SO, S)
    eye_b = jnp.eye(B, dtype=jnp.float32)
    # out[b*SO+o, c] = sum_t wrd[o,t]*r[t*B+b, c] + mean3[b, c] + brd[o]
    w_time = jnp.einsum("ot,bc->botc", wrd, eye_b).reshape(B * SO, S * B)
    w_mean = jnp.einsum("o,bc->boc", jnp.ones((SO,), jnp.float32), eye_b).reshape(B * SO, B)
    brd_col = jnp.tile(params["brd"].astype(jnp.float32).reshape(SO), (B,)).reshape(B * SO, 1)
    wred = jnp.concatenate([w_time, w_mean, brd_col], axis=1)        # (B*SO, NRED)

    wsmall = jnp.concatenate([
        _pad2(params["bb"], 1, CPAD),        # row 0
        _pad2(bh, 1, CPAD),                  # row 1
        _pad2(params["bfc"], 1, CPAD),       # row 2
        jnp.zeros((5, CPAD), jnp.float32),   # rows 3:8 (alignment pad)
        _pad2(params["wfc"], H, CPAD),       # rows 8:8+H
        _pad2(wred, B * SO, CPAD),           # rows 8+H:8+H+B*SO
    ], axis=0)

    vmem = pl.BlockSpec(memory_space=pltpu.MemorySpace.VMEM)
    out2 = pl.pallas_call(
        functools.partial(cfc_kernel, H=H, U=U, SO=SO),
        out_shape=jax.ShapeDtypeStruct((B * SO, 3), jnp.float32),
        in_specs=[vmem, vmem, vmem],
        out_specs=vmem,
    )(x_sbf, wmm, wsmall)
    return out2.reshape(B, SO, 3)


# --------------------------- reference (pure JAX) ---------------------------
def cfc_reference(x, params, *, hidden_size):
    xx = jnp.transpose(jnp.squeeze(x, 1), (0, 2, 1))           # (B, S, F)
    mean = jnp.mean(xx, axis=1, keepdims=True)                 # (B, 1, F)
    xc = xx - mean
    B, S, _ = xc.shape
    h = jnp.zeros((B, hidden_size), jnp.float32)
    hs = []
    for t in range(S):
        xt = xc[:, t]
        z = xt @ params["wbx"] + h @ params["wbh"] + params["bb"]
        g = 1.7159 * jnp.tanh(0.666 * z)
        ff1 = jnp.tanh(g @ params["wf1"] + params["bf1"])
        ff2 = jnp.tanh(g @ params["wf2"] + params["bf2"])
        t_a = g @ params["wta"] + params["bta"]
        t_b = g @ params["wtb"] + params["btb"]
        ti = jax.nn.sigmoid(t_a * 1.0 + t_b)
        h = ff1 * (1.0 - ti) + ti * ff2
        hs.append(h)
    r = jnp.stack(hs, axis=1) @ params["wfc"] + params["bfc"]            # (B, S, 3)
    r = jnp.einsum("bsc,os->boc", r, params["wrd"]) + params["brd"].reshape(1, -1, 1)
    r = r + mean[:, :, 0:3]
    return r


# --------------------------------- main --------------------------------------
if __name__ == "__main__":
    # small config consistent with the module
    B, F, S = 2, 4, 8          # batch, in_features, seq_in_len
    H, U = 32, 64              # hidden_size, backbone_units
    SO = 4                     # seq_out_len

    key = jax.random.PRNGKey(0)
    ks = jax.random.split(key, 20)

    def unif(k, shape, fan_in):
        bound = 1.0 / np.sqrt(fan_in)
        return jax.random.uniform(k, shape, jnp.float32, -bound, bound)

    params = {
        # backbone Linear(F+H, U): split into x-part and h-part of W^T
        "wbx": unif(ks[0], (F, U), F + H), "wbh": unif(ks[1], (H, U), F + H),
        "bb": unif(ks[2], (1, U), F + H),
        "wf1": unif(ks[3], (U, H), U), "bf1": unif(ks[4], (1, H), U),
        "wf2": unif(ks[5], (U, H), U), "bf2": unif(ks[6], (1, H), U),
        "wta": unif(ks[7], (U, H), U), "bta": unif(ks[8], (1, H), U),
        "wtb": unif(ks[9], (U, H), U), "btb": unif(ks[10], (1, H), U),
        "wfc": unif(ks[11], (H, 3), H), "bfc": unif(ks[12], (1, 3), H),
        "wrd": unif(ks[13], (SO, S), S), "brd": unif(ks[14], (SO, 1), S),
    }

    x = jax.random.normal(ks[15], (B, 1, F, S), jnp.float32)

    run = jax.jit(functools.partial(cfc_forward, hidden_size=H, seq_out_len=SO))
    out = run(x, params)
    jax.block_until_ready(out)

    ref = cfc_reference(x, params, hidden_size=H)
    np.testing.assert_allclose(np.asarray(out), np.asarray(ref),
                               rtol=1e-4, atol=1e-4)
    print("KERNEL_OK")
</pallas_src>

<mosaic_0001>
module attributes {stable_mosaic.version = 11 : i64} {
  func.func @cfc_kernel(%arg0: memref<8x2x4xf32, #tpu.memory_space<vmem>>, %arg1: memref<104x96xf32, #tpu.memory_space<vmem>>, %arg2: memref<48x96xf32, #tpu.memory_space<vmem>>, %arg3: memref<8x3xf32, #tpu.memory_space<vmem>>) attributes {dimension_semantics = [], scalar_prefetch = 0 : i64, scratch_operands = 0 : i64, tpu.core_type = #tpu.core_type<tc>} {
    %c0 = arith.constant 0 : index
    %c0_0 = arith.constant 0 : index
    %0 = vector.load %arg1[%c0, %c0_0] : memref<104x96xf32, #tpu.memory_space<vmem>>, vector<4x64xf32>
    %c8 = arith.constant 8 : index
    %c0_1 = arith.constant 0 : index
    %1 = vector.load %arg1[%c8, %c0_1] : memref<104x96xf32, #tpu.memory_space<vmem>>, vector<32x64xf32>
    %c40 = arith.constant 40 : index
    %c0_2 = arith.constant 0 : index
    %2 = vector.load %arg1[%c40, %c0_2] : memref<104x96xf32, #tpu.memory_space<vmem>>, vector<64x96xf32>
    %c0_3 = arith.constant 0 : index
    %c0_4 = arith.constant 0 : index
    %3 = vector.load %arg2[%c0_3, %c0_4] : memref<48x96xf32, #tpu.memory_space<vmem>>, vector<1x64xf32>
    %c1 = arith.constant 1 : index
    %c0_5 = arith.constant 0 : index
    %4 = vector.load %arg2[%c1, %c0_5] : memref<48x96xf32, #tpu.memory_space<vmem>>, vector<1x96xf32>
    %c2 = arith.constant 2 : index
    %c0_6 = arith.constant 0 : index
    %5 = vector.load %arg2[%c2, %c0_6] : memref<48x96xf32, #tpu.memory_space<vmem>>, vector<1x3xf32>
    %c8_7 = arith.constant 8 : index
    %c0_8 = arith.constant 0 : index
    %6 = vector.load %arg2[%c8_7, %c0_8] : memref<48x96xf32, #tpu.memory_space<vmem>>, vector<32x3xf32>
    %c40_9 = arith.constant 40 : index
    %c0_10 = arith.constant 0 : index
    %7 = vector.load %arg2[%c40_9, %c0_10] : memref<48x96xf32, #tpu.memory_space<vmem>>, vector<8x19xf32>
    %c0_11 = arith.constant 0 : index
    %c0_12 = arith.constant 0 : index
    %c0_13 = arith.constant 0 : index
    %8 = vector.load %arg0[%c0_11, %c0_12, %c0_13] : memref<8x2x4xf32, #tpu.memory_space<vmem>>, vector<8x2x4xf32>
    %cst = arith.constant dense<0.000000e+00> : vector<2x4xf32>
    %9 = vector.multi_reduction <add>, %8, %cst [0] : vector<8x2x4xf32> to vector<2x4xf32>
    %cst_14 = arith.constant 8.000000e+00 : f32
    %10 = vector.broadcast %cst_14 : f32 to vector<2x4xf32>
    %11 = arith.divf %9, %10 : vector<2x4xf32>
    %12 = vector.shape_cast %11 : vector<2x4xf32> to vector<1x2x4xf32>
    %13 = vector.broadcast %12 : vector<1x2x4xf32> to vector<8x2x4xf32>
    %14 = arith.subf %8, %13 : vector<8x2x4xf32>
    %15 = vector.shape_cast %14 : vector<8x2x4xf32> to vector<16x4xf32>
    %cst_15 = arith.constant dense<0.000000e+00> : vector<16x64xf32>
    %16 = tpu.matmul %15, %0, %cst_15 {dimension_numbers = #tpu.dot_dimension_numbers<[1], [0], [0], [1], [0, 0, 1, 1], [], []>} : vector<16x4xf32>, vector<4x64xf32>, vector<16x64xf32> -> vector<16x64xf32>
    %17 = vector.broadcast %3 : vector<1x64xf32> to vector<16x64xf32>
    %18 = arith.addf %16, %17 : vector<16x64xf32>
    %19 = vector.shape_cast %4 : vector<1x96xf32> to vector<1x96xf32>
    %20 = vector.broadcast %19 : vector<1x96xf32> to vector<2x96xf32>
    %cst_16 = arith.constant 0.000000e+00 : f32
    %21 = vector.broadcast %cst_16 : f32 to vector<2x32xf32>
    %22 = vector.extract_strided_slice %18 {offsets = [0, 0], sizes = [2, 64], strides = [1, 1]} : vector<16x64xf32> to vector<2x64xf32>
    %cst_17 = arith.constant dense<0.000000e+00> : vector<2x64xf32>
    %23 = tpu.matmul %21, %1, %cst_17 {dimension_numbers = #tpu.dot_dimension_numbers<[1], [0], [0], [1], [0, 0, 1, 1], [], []>} : vector<2x32xf32>, vector<32x64xf32>, vector<2x64xf32> -> vector<2x64xf32>
    %24 = arith.addf %22, %23 : vector<2x64xf32>
    %cst_18 = arith.constant 6.660000e-01 : f32
    %25 = vector.broadcast %cst_18 : f32 to vector<2x64xf32>
    %26 = arith.mulf %25, %24 : vector<2x64xf32>
    %27 = math.tanh %26 : vector<2x64xf32>
    %cst_19 = arith.constant 1.715900e+00 : f32
    %28 = vector.broadcast %cst_19 : f32 to vector<2x64xf32>
    %29 = arith.mulf %28, %27 : vector<2x64xf32>
    %cst_20 = arith.constant dense<0.000000e+00> : vector<2x96xf32>
    %30 = tpu.matmul %29, %2, %cst_20 {dimension_numbers = #tpu.dot_dimension_numbers<[1], [0], [0], [1], [0, 0, 1, 1], [], []>} : vector<2x64xf32>, vector<64x96xf32>, vector<2x96xf32> -> vector<2x96xf32>
    %31 = arith.addf %30, %20 : vector<2x96xf32>
    %32 = vector.extract_strided_slice %31 {offsets = [0, 0], sizes = [2, 32], strides = [1, 1]} : vector<2x96xf32> to vector<2x32xf32>
    %33 = math.tanh %32 : vector<2x32xf32>
    %34 = vector.extract_strided_slice %31 {offsets = [0, 32], sizes = [2, 32], strides = [1, 1]} : vector<2x96xf32> to vector<2x32xf32>
    %35 = math.tanh %34 : vector<2x32xf32>
    %36 = vector.extract_strided_slice %31 {offsets = [0, 64], sizes = [2, 32], strides = [1, 1]} : vector<2x96xf32> to vector<2x32xf32>
    %37 = arith.negf %36 : vector<2x32xf32>
    %38 = math.exp %37 : vector<2x32xf32>
    %cst_21 = arith.constant 1.000000e+00 : f32
    %39 = vector.broadcast %cst_21 : f32 to vector<2x32xf32>
    %40 = arith.addf %39, %38 : vector<2x32xf32>
    %41 = arith.divf %39, %40 : vector<2x32xf32>
    %cst_22 = arith.constant 1.000000e+00 : f32
    %42 = vector.broadcast %cst_22 : f32 to vector<2x32xf32>
    %43 = arith.subf %42, %41 : vector<2x32xf32>
    %44 = arith.mulf %33, %43 : vector<2x32xf32>
    %45 = arith.mulf %41, %35 : vector<2x32xf32>
    %46 = arith.addf %44, %45 : vector<2x32xf32>
    %47 = vector.extract_strided_slice %18 {offsets = [2, 0], sizes = [2, 64], strides = [1, 1]} : vector<16x64xf32> to vector<2x64xf32>
    %cst_23 = arith.constant dense<0.000000e+00> : vector<2x64xf32>
    %48 = tpu.matmul %46, %1, %cst_23 {dimension_numbers = #tpu.dot_dimension_numbers<[1], [0], [0], [1], [0, 0, 1, 1], [], []>} : vector<2x32xf32>, vector<32x64xf32>, vector<2x64xf32> -> vector<2x64xf32>
    %49 = arith.addf %47, %48 : vector<2x64xf32>
    %cst_24 = arith.constant 6.660000e-01 : f32
    %50 = vector.broadcast %cst_24 : f32 to vector<2x64xf32>
    %51 = arith.mulf %50, %49 : vector<2x64xf32>
    %52 = math.tanh %51 : vector<2x64xf32>
    %cst_25 = arith.constant 1.715900e+00 : f32
    %53 = vector.broadcast %cst_25 : f32 to vector<2x64xf32>
    %54 = arith.mulf %53, %52 : vector<2x64xf32>
    %cst_26 = arith.constant dense<0.000000e+00> : vector<2x96xf32>
    %55 = tpu.matmul %54, %2, %cst_26 {dimension_numbers = #tpu.dot_dimension_numbers<[1], [0], [0], [1], [0, 0, 1, 1], [], []>} : vector<2x64xf32>, vector<64x96xf32>, vector<2x96xf32> -> vector<2x96xf32>
    %56 = arith.addf %55, %20 : vector<2x96xf32>
    %57 = vector.extract_strided_slice %56 {offsets = [0, 0], sizes = [2, 32], strides = [1, 1]} : vector<2x96xf32> to vector<2x32xf32>
    %58 = math.tanh %57 : vector<2x32xf32>
    %59 = vector.extract_strided_slice %56 {offsets = [0, 32], sizes = [2, 32], strides = [1, 1]} : vector<2x96xf32> to vector<2x32xf32>
    %60 = math.tanh %59 : vector<2x32xf32>
    %61 = vector.extract_strided_slice %56 {offsets = [0, 64], sizes = [2, 32], strides = [1, 1]} : vector<2x96xf32> to vector<2x32xf32>
    %62 = arith.negf %61 : vector<2x32xf32>
    %63 = math.exp %62 : vector<2x32xf32>
    %cst_27 = arith.constant 1.000000e+00 : f32
    %64 = vector.broadcast %cst_27 : f32 to vector<2x32xf32>
    %65 = arith.addf %64, %63 : vector<2x32xf32>
    %66 = arith.divf %64, %65 : vector<2x32xf32>
    %cst_28 = arith.constant 1.000000e+00 : f32
    %67 = vector.broadcast %cst_28 : f32 to vector<2x32xf32>
    %68 = arith.subf %67, %66 : vector<2x32xf32>
    %69 = arith.mulf %58, %68 : vector<2x32xf32>
    %70 = arith.mulf %66, %60 : vector<2x32xf32>
    %71 = arith.addf %69, %70 : vector<2x32xf32>
    %72 = vector.extract_strided_slice %18 {offsets = [4, 0], sizes = [2, 64], strides = [1, 1]} : vector<16x64xf32> to vector<2x64xf32>
    %cst_29 = arith.constant dense<0.000000e+00> : vector<2x64xf32>
    %73 = tpu.matmul %71, %1, %cst_29 {dimension_numbers = #tpu.dot_dimension_numbers<[1], [0], [0], [1], [0, 0, 1, 1], [], []>} : vector<2x32xf32>, vector<32x64xf32>, vector<2x64xf32> -> vector<2x64xf32>
    %74 = arith.addf %72, %73 : vector<2x64xf32>
    %cst_30 = arith.constant 6.660000e-01 : f32
    %75 = vector.broadcast %cst_30 : f32 to vector<2x64xf32>
    %76 = arith.mulf %75, %74 : vector<2x64xf32>
    %77 = math.tanh %76 : vector<2x64xf32>
    %cst_31 = arith.constant 1.715900e+00 : f32
    %78 = vector.broadcast %cst_31 : f32 to vector<2x64xf32>
    %79 = arith.mulf %78, %77 : vector<2x64xf32>
    %cst_32 = arith.constant dense<0.000000e+00> : vector<2x96xf32>
    %80 = tpu.matmul %79, %2, %cst_32 {dimension_numbers = #tpu.dot_dimension_numbers<[1], [0], [0], [1], [0, 0, 1, 1], [], []>} : vector<2x64xf32>, vector<64x96xf32>, vector<2x96xf32> -> vector<2x96xf32>
    %81 = arith.addf %80, %20 : vector<2x96xf32>
    %82 = vector.extract_strided_slice %81 {offsets = [0, 0], sizes = [2, 32], strides = [1, 1]} : vector<2x96xf32> to vector<2x32xf32>
    %83 = math.tanh %82 : vector<2x32xf32>
    %84 = vector.extract_strided_slice %81 {offsets = [0, 32], sizes = [2, 32], strides = [1, 1]} : vector<2x96xf32> to vector<2x32xf32>
    %85 = math.tanh %84 : vector<2x32xf32>
    %86 = vector.extract_strided_slice %81 {offsets = [0, 64], sizes = [2, 32], strides = [1, 1]} : vector<2x96xf32> to vector<2x32xf32>
    %87 = arith.negf %86 : vector<2x32xf32>
    %88 = math.exp %87 : vector<2x32xf32>
    %cst_33 = arith.constant 1.000000e+00 : f32
    %89 = vector.broadcast %cst_33 : f32 to vector<2x32xf32>
    %90 = arith.addf %89, %88 : vector<2x32xf32>
    %91 = arith.divf %89, %90 : vector<2x32xf32>
    %cst_34 = arith.constant 1.000000e+00 : f32
    %92 = vector.broadcast %cst_34 : f32 to vector<2x32xf32>
    %93 = arith.subf %92, %91 : vector<2x32xf32>
    %94 = arith.mulf %83, %93 : vector<2x32xf32>
    %95 = arith.mulf %91, %85 : vector<2x32xf32>
    %96 = arith.addf %94, %95 : vector<2x32xf32>
    %97 = vector.extract_strided_slice %18 {offsets = [6, 0], sizes = [2, 64], strides = [1, 1]} : vector<16x64xf32> to vector<2x64xf32>
    %cst_35 = arith.constant dense<0.000000e+00> : vector<2x64xf32>
    %98 = tpu.matmul %96, %1, %cst_35 {dimension_numbers = #tpu.dot_dimension_numbers<[1], [0], [0], [1], [0, 0, 1, 1], [], []>} : vector<2x32xf32>, vector<32x64xf32>, vector<2x64xf32> -> vector<2x64xf32>
    %99 = arith.addf %97, %98 : vector<2x64xf32>
    %cst_36 = arith.constant 6.660000e-01 : f32
    %100 = vector.broadcast %cst_36 : f32 to vector<2x64xf32>
    %101 = arith.mulf %100, %99 : vector<2x64xf32>
    %102 = math.tanh %101 : vector<2x64xf32>
    %cst_37 = arith.constant 1.715900e+00 : f32
    %103 = vector.broadcast %cst_37 : f32 to vector<2x64xf32>
    %104 = arith.mulf %103, %102 : vector<2x64xf32>
    %cst_38 = arith.constant dense<0.000000e+00> : vector<2x96xf32>
    %105 = tpu.matmul %104, %2, %cst_38 {dimension_numbers = #tpu.dot_dimension_numbers<[1], [0], [0], [1], [0, 0, 1, 1], [], []>} : vector<2x64xf32>, vector<64x96xf32>, vector<2x96xf32> -> vector<2x96xf32>
    %106 = arith.addf %105, %20 : vector<2x96xf32>
    %107 = vector.extract_strided_slice %106 {offsets = [0, 0], sizes = [2, 32], strides = [1, 1]} : vector<2x96xf32> to vector<2x32xf32>
    %108 = math.tanh %107 : vector<2x32xf32>
    %109 = vector.extract_strided_slice %106 {offsets = [0, 32], sizes = [2, 32], strides = [1, 1]} : vector<2x96xf32> to vector<2x32xf32>
    %110 = math.tanh %109 : vector<2x32xf32>
    %111 = vector.extract_strided_slice %106 {offsets = [0, 64], sizes = [2, 32], strides = [1, 1]} : vector<2x96xf32> to vector<2x32xf32>
    %112 = arith.negf %111 : vector<2x32xf32>
    %113 = math.exp %112 : vector<2x32xf32>
    %cst_39 = arith.constant 1.000000e+00 : f32
    %114 = vector.broadcast %cst_39 : f32 to vector<2x32xf32>
    %115 = arith.addf %114, %113 : vector<2x32xf32>
    %116 = arith.divf %114, %115 : vector<2x32xf32>
    %cst_40 = arith.constant 1.000000e+00 : f32
    %117 = vector.broadcast %cst_40 : f32 to vector<2x32xf32>
    %118 = arith.subf %117, %116 : vector<2x32xf32>
    %119 = arith.mulf %108, %118 : vector<2x32xf32>
    %120 = arith.mulf %116, %110 : vector<2x32xf32>
    %121 = arith.addf %119, %120 : vector<2x32xf32>
    %122 = vector.extract_strided_slice %18 {offsets = [8, 0], sizes = [2, 64], strides = [1, 1]} : vector<16x64xf32> to vector<2x64xf32>
    %cst_41 = arith.constant dense<0.000000e+00> : vector<2x64xf32>
    %123 = tpu.matmul %121, %1, %cst_41 {dimension_numbers = #tpu.dot_dimension_numbers<[1], [0], [0], [1], [0, 0, 1, 1], [], []>} : vector<2x32xf32>, vector<32x64xf32>, vector<2x64xf32> -> vector<2x64xf32>
    %124 = arith.addf %122, %123 : vector<2x64xf32>
    %cst_42 = arith.constant 6.660000e-01 : f32
    %125 = vector.broadcast %cst_42 : f32 to vector<2x64xf32>
    %126 = arith.mulf %125, %124 : vector<2x64xf32>
    %127 = math.tanh %126 : vector<2x64xf32>
    %cst_43 = arith.constant 1.715900e+00 : f32
    %128 = vector.broadcast %cst_43 : f32 to vector<2x64xf32>
    %129 = arith.mulf %128, %127 : vector<2x64xf32>
    %cst_44 = arith.constant dense<0.000000e+00> : vector<2x96xf32>
    %130 = tpu.matmul %129, %2, %cst_44 {dimension_numbers = #tpu.dot_dimension_numbers<[1], [0], [0], [1], [0, 0, 1, 1], [], []>} : vector<2x64xf32>, vector<64x96xf32>, vector<2x96xf32> -> vector<2x96xf32>
    %131 = arith.addf %130, %20 : vector<2x96xf32>
    %132 = vector.extract_strided_slice %131 {offsets = [0, 0], sizes = [2, 32], strides = [1, 1]} : vector<2x96xf32> to vector<2x32xf32>
    %133 = math.tanh %132 : vector<2x32xf32>
    %134 = vector.extract_strided_slice %131 {offsets = [0, 32], sizes = [2, 32], strides = [1, 1]} : vector<2x96xf32> to vector<2x32xf32>
    %135 = math.tanh %134 : vector<2x32xf32>
    %136 = vector.extract_strided_slice %131 {offsets = [0, 64], sizes = [2, 32], strides = [1, 1]} : vector<2x96xf32> to vector<2x32xf32>
    %137 = arith.negf %136 : vector<2x32xf32>
    %138 = math.exp %137 : vector<2x32xf32>
    %cst_45 = arith.constant 1.000000e+00 : f32
    %139 = vector.broadcast %cst_45 : f32 to vector<2x32xf32>
    %140 = arith.addf %139, %138 : vector<2x32xf32>
    %141 = arith.divf %139, %140 : vector<2x32xf32>
    %cst_46 = arith.constant 1.000000e+00 : f32
    %142 = vector.broadcast %cst_46 : f32 to vector<2x32xf32>
    %143 = arith.subf %142, %141 : vector<2x32xf32>
    %144 = arith.mulf %133, %143 : vector<2x32xf32>
    %145 = arith.mulf %141, %135 : vector<2x32xf32>
    %146 = arith.addf %144, %145 : vector<2x32xf32>
    %147 = vector.extract_strided_slice %18 {offsets = [10, 0], sizes = [2, 64], strides = [1, 1]} : vector<16x64xf32> to vector<2x64xf32>
    %cst_47 = arith.constant dense<0.000000e+00> : vector<2x64xf32>
    %148 = tpu.matmul %146, %1, %cst_47 {dimension_numbers = #tpu.dot_dimension_numbers<[1], [0], [0], [1], [0, 0, 1, 1], [], []>} : vector<2x32xf32>, vector<32x64xf32>, vector<2x64xf32> -> vector<2x64xf32>
    %149 = arith.addf %147, %148 : vector<2x64xf32>
    %cst_48 = arith.constant 6.660000e-01 : f32
    %150 = vector.broadcast %cst_48 : f32 to vector<2x64xf32>
    %151 = arith.mulf %150, %149 : vector<2x64xf32>
    %152 = math.tanh %151 : vector<2x64xf32>
    %cst_49 = arith.constant 1.715900e+00 : f32
    %153 = vector.broadcast %cst_49 : f32 to vector<2x64xf32>
    %154 = arith.mulf %153, %152 : vector<2x64xf32>
    %cst_50 = arith.constant dense<0.000000e+00> : vector<2x96xf32>
    %155 = tpu.matmul %154, %2, %cst_50 {dimension_numbers = #tpu.dot_dimension_numbers<[1], [0], [0], [1], [0, 0, 1, 1], [], []>} : vector<2x64xf32>, vector<64x96xf32>, vector<2x96xf32> -> vector<2x96xf32>
    %156 = arith.addf %155, %20 : vector<2x96xf32>
    %157 = vector.extract_strided_slice %156 {offsets = [0, 0], sizes = [2, 32], strides = [1, 1]} : vector<2x96xf32> to vector<2x32xf32>
    %158 = math.tanh %157 : vector<2x32xf32>
    %159 = vector.extract_strided_slice %156 {offsets = [0, 32], sizes = [2, 32], strides = [1, 1]} : vector<2x96xf32> to vector<2x32xf32>
    %160 = math.tanh %159 : vector<2x32xf32>
    %161 = vector.extract_strided_slice %156 {offsets = [0, 64], sizes = [2, 32], strides = [1, 1]} : vector<2x96xf32> to vector<2x32xf32>
    %162 = arith.negf %161 : vector<2x32xf32>
    %163 = math.exp %162 : vector<2x32xf32>
    %cst_51 = arith.constant 1.000000e+00 : f32
    %164 = vector.broadcast %cst_51 : f32 to vector<2x32xf32>
    %165 = arith.addf %164, %163 : vector<2x32xf32>
    %166 = arith.divf %164, %165 : vector<2x32xf32>
    %cst_52 = arith.constant 1.000000e+00 : f32
    %167 = vector.broadcast %cst_52 : f32 to vector<2x32xf32>
    %168 = arith.subf %167, %166 : vector<2x32xf32>
    %169 = arith.mulf %158, %168 : vector<2x32xf32>
    %170 = arith.mulf %166, %160 : vector<2x32xf32>
    %171 = arith.addf %169, %170 : vector<2x32xf32>
    %172 = vector.extract_strided_slice %18 {offsets = [12, 0], sizes = [2, 64], strides = [1, 1]} : vector<16x64xf32> to vector<2x64xf32>
    %cst_53 = arith.constant dense<0.000000e+00> : vector<2x64xf32>
    %173 = tpu.matmul %171, %1, %cst_53 {dimension_numbers = #tpu.dot_dimension_numbers<[1], [0], [0], [1], [0, 0, 1, 1], [], []>} : vector<2x32xf32>, vector<32x64xf32>, vector<2x64xf32> -> vector<2x64xf32>
    %174 = arith.addf %172, %173 : vector<2x64xf32>
    %cst_54 = arith.constant 6.660000e-01 : f32
    %175 = vector.broadcast %cst_54 : f32 to vector<2x64xf32>
    %176 = arith.mulf %175, %174 : vector<2x64xf32>
    %177 = math.tanh %176 : vector<2x64xf32>
    %cst_55 = arith.constant 1.715900e+00 : f32
    %178 = vector.broadcast %cst_55 : f32 to vector<2x64xf32>
    %179 = arith.mulf %178, %177 : vector<2x64xf32>
    %cst_56 = arith.constant dense<0.000000e+00> : vector<2x96xf32>
    %180 = tpu.matmul %179, %2, %cst_56 {dimension_numbers = #tpu.dot_dimension_numbers<[1], [0], [0], [1], [0, 0, 1, 1], [], []>} : vector<2x64xf32>, vector<64x96xf32>, vector<2x96xf32> -> vector<2x96xf32>
    %181 = arith.addf %180, %20 : vector<2x96xf32>
    %182 = vector.extract_strided_slice %181 {offsets = [0, 0], sizes = [2, 32], strides = [1, 1]} : vector<2x96xf32> to vector<2x32xf32>
    %183 = math.tanh %182 : vector<2x32xf32>
    %184 = vector.extract_strided_slice %181 {offsets = [0, 32], sizes = [2, 32], strides = [1, 1]} : vector<2x96xf32> to vector<2x32xf32>
    %185 = math.tanh %184 : vector<2x32xf32>
    %186 = vector.extract_strided_slice %181 {offsets = [0, 64], sizes = [2, 32], strides = [1, 1]} : vector<2x96xf32> to vector<2x32xf32>
    %187 = arith.negf %186 : vector<2x32xf32>
    %188 = math.exp %187 : vector<2x32xf32>
    %cst_57 = arith.constant 1.000000e+00 : f32
    %189 = vector.broadcast %cst_57 : f32 to vector<2x32xf32>
    %190 = arith.addf %189, %188 : vector<2x32xf32>
    %191 = arith.divf %189, %190 : vector<2x32xf32>
    %cst_58 = arith.constant 1.000000e+00 : f32
    %192 = vector.broadcast %cst_58 : f32 to vector<2x32xf32>
    %193 = arith.subf %192, %191 : vector<2x32xf32>
    %194 = arith.mulf %183, %193 : vector<2x32xf32>
    %195 = arith.mulf %191, %185 : vector<2x32xf32>
    %196 = arith.addf %194, %195 : vector<2x32xf32>
    %197 = vector.extract_strided_slice %18 {offsets = [14, 0], sizes = [2, 64], strides = [1, 1]} : vector<16x64xf32> to vector<2x64xf32>
    %cst_59 = arith.constant dense<0.000000e+00> : vector<2x64xf32>
    %198 = tpu.matmul %196, %1, %cst_59 {dimension_numbers = #tpu.dot_dimension_numbers<[1], [0], [0], [1], [0, 0, 1, 1], [], []>} : vector<2x32xf32>, vector<32x64xf32>, vector<2x64xf32> -> vector<2x64xf32>
    %199 = arith.addf %197, %198 : vector<2x64xf32>
    %cst_60 = arith.constant 6.660000e-01 : f32
    %200 = vector.broadcast %cst_60 : f32 to vector<2x64xf32>
    %201 = arith.mulf %200, %199 : vector<2x64xf32>
    %202 = math.tanh %201 : vector<2x64xf32>
    %cst_61 = arith.constant 1.715900e+00 : f32
    %203 = vector.broadcast %cst_61 : f32 to vector<2x64xf32>
    %204 = arith.mulf %203, %202 : vector<2x64xf32>
    %cst_62 = arith.constant dense<0.000000e+00> : vector<2x96xf32>
    %205 = tpu.matmul %204, %2, %cst_62 {dimension_numbers = #tpu.dot_dimension_numbers<[1], [0], [0], [1], [0, 0, 1, 1], [], []>} : vector<2x64xf32>, vector<64x96xf32>, vector<2x96xf32> -> vector<2x96xf32>
    %206 = arith.addf %205, %20 : vector<2x96xf32>
    %207 = vector.extract_strided_slice %206 {offsets = [0, 0], sizes = [2, 32], strides = [1, 1]} : vector<2x96xf32> to vector<2x32xf32>
    %208 = math.tanh %207 : vector<2x32xf32>
    %209 = vector.extract_strided_slice %206 {offsets = [0, 32], sizes = [2, 32], strides = [1, 1]} : vector<2x96xf32> to vector<2x32xf32>
    %210 = math.tanh %209 : vector<2x32xf32>
    %211 = vector.extract_strided_slice %206 {offsets = [0, 64], sizes = [2, 32], strides = [1, 1]} : vector<2x96xf32> to vector<2x32xf32>
    %212 = arith.negf %211 : vector<2x32xf32>
    %213 = math.exp %212 : vector<2x32xf32>
    %cst_63 = arith.constant 1.000000e+00 : f32
    %214 = vector.broadcast %cst_63 : f32 to vector<2x32xf32>
    %215 = arith.addf %214, %213 : vector<2x32xf32>
    %216 = arith.divf %214, %215 : vector<2x32xf32>
    %cst_64 = arith.constant 1.000000e+00 : f32
    %217 = vector.broadcast %cst_64 : f32 to vector<2x32xf32>
    %218 = arith.subf %217, %216 : vector<2x32xf32>
    %219 = arith.mulf %208, %218 : vector<2x32xf32>
    %220 = arith.mulf %216, %210 : vector<2x32xf32>
    %221 = arith.addf %219, %220 : vector<2x32xf32>
    %222 = tpu.concatenate %46, %71, %96, %121, %146, %171, %196, %221 in 0 : vector<2x32xf32>, vector<2x32xf32>, vector<2x32xf32>, vector<2x32xf32>, vector<2x32xf32>, vector<2x32xf32>, vector<2x32xf32>, vector<2x32xf32> -> vector<16x32xf32>
    %cst_65 = arith.constant dense<0.000000e+00> : vector<16x3xf32>
    %223 = tpu.matmul %222, %6, %cst_65 {dimension_numbers = #tpu.dot_dimension_numbers<[1], [0], [0], [1], [0, 0, 1, 1], [], []>} : vector<16x32xf32>, vector<32x3xf32>, vector<16x3xf32> -> vector<16x3xf32>
    %224 = vector.broadcast %5 : vector<1x3xf32> to vector<16x3xf32>
    %225 = arith.addf %223, %224 : vector<16x3xf32>
    %226 = vector.extract_strided_slice %11 {offsets = [0, 0], sizes = [2, 3], strides = [1, 1]} : vector<2x4xf32> to vector<2x3xf32>
    %cst_66 = arith.constant 1.000000e+00 : f32
    %227 = vector.broadcast %cst_66 : f32 to vector<1x3xf32>
    %228 = tpu.concatenate %225, %226, %227 in 0 : vector<16x3xf32>, vector<2x3xf32>, vector<1x3xf32> -> vector<19x3xf32>
    %cst_67 = arith.constant dense<0.000000e+00> : vector<8x3xf32>
    %229 = tpu.matmul %7, %228, %cst_67 {dimension_numbers = #tpu.dot_dimension_numbers<[1], [0], [0], [1], [0, 0, 1, 1], [], []>} : vector<8x19xf32>, vector<19x3xf32>, vector<8x3xf32> -> vector<8x3xf32>
    %c0_68 = arith.constant 0 : index
    %c0_69 = arith.constant 0 : index
    %230 = vector.load %arg3[%c0_68, %c0_69] : memref<8x3xf32, #tpu.memory_space<vmem>>, vector<8x3xf32>
    tpu.vector_store %arg3[%c0_68, %c0_69], %229 {strides = array<i32>} : memref<8x3xf32, #tpu.memory_space<vmem>>, vector<8x3xf32>,
    return
  }
}

</mosaic_0001>

<bundles_post_ra>
// kernel: tile.6
= control target key start
LH: loop header
LB: loop body
LE: loop exit
PB: predicated region body
PF: predicated region fallthrough
CT: control target
= control target key end

     0   :  { %s22_s0 = inlined_call_operand.vmem [shape: f32[4], index: 0, kind: input, shape index: {}]   ;;  %s23_s1 = inlined_call_operand.vmem [shape: f32[2,4], index: 1, kind: output, shape index: {}]  }
   0x1   :  { %v4_v0 = vld [vmem:[%s22_s0] ss:$0 sm:$0xff] }
   0x2   :  { %5 = vst [vmem:[%s23_s1] sm:$0x3] %v4_v0 }

// kernel: tile.0
= control target key start
LH: loop header
LB: loop body
LE: loop exit
PB: predicated region body
PF: predicated region fallthrough
CT: control target
= control target key end

     0   :  { %s34_s8 = smov 125   ;;  %vm7_vm0 = vcmask 7168   ;;  %s35_s11 = smov 126   ;;  %s61_s0 = inlined_call_operand.vmem [shape: f32[2,4], index: 0, kind: input, shape index: {}]   ;;  %s62_s1 = inlined_call_operand.vmem [shape: f32[8,1], index: 1, kind: output, shape index: {}]  }
   0x1   :  { %v4_v0 = vld [vmem:[%s61_s0] sm:$0x3]  ;;  %s33_s0 = smov 127  }
   0x2   :  { %5 = vst [vmem:[#allocation0] sm:$0x3] %v4_v0 }
   0x9   :  { %v9_v1 = vld [vmem:[#allocation0] sm:$0x3]  }
   0xa   :  { %v21_v2 = vld [vmem:[#allocation0] sm:$0x3]   ;;  %10 = vrot.lane.b32.xlu0 %v9_v1, %s33_s0 }
   0xb   :  { %22 = vrot.lane.b32.xlu1 %v21_v2, %s34_s8  ;;  %v6_v3 = vld [vmem:[#allocation0] sm:$0x3]  }
   0xc   :  { %v15_v4 = vld [vmem:[#allocation0] sm:$0x3]   ;;  %8 = vst.msk [vmem:[%s62_s1] ss:$4 sm:$0x3] %vm7_vm0, %v6_v3  }
   0xe   :  { %16 = vrot.lane.b32.xlu0 %v15_v4, %s35_s11 }
  0x7c   :  { %v11_v5 = vpop.permute.xlu0 %10  }
  0x7d   :  { %v23_v6 = vpop.permute.xlu1 %22   ;;  %27 = vst.msk [vmem:[%s62_s1 + $0x1] ss:$4 sm:$0x3] %vm7_vm0, %v11_v5  }
  0x7e   :  { %29 = vst.msk [vmem:[%s62_s1 + $0x3] ss:$4 sm:$0x3] %vm7_vm0, %v23_v6  }
  0x80   :  { %v17_v7 = vpop.permute.xlu0 %16  }
  0x81   :  { %28 = vst.msk [vmem:[%s62_s1 + $0x2] ss:$4 sm:$0x3] %vm7_vm0, %v17_v7  }

// kernel: cfc_forward.1
= control target key start
LH: loop header
LB: loop body
LE: loop exit
PB: predicated region body
PF: predicated region fallthrough
CT: control target
= control target key end

     0   :  { %vm120_vm0 = vcmask 1043456   ;;  %v2452_v0 = vmov 0.0|0.0   ;;  %vm43_vm1 = vcmask 25600   ;;  %vm2453_vm2 = vmmov 0   ;;  %s2456_s29 = smov 32   ;;  %s2457_s30 = smov 64   ;;  %s2815_s1 = inlined_call_operand.vmem [shape: f32[104,96], index: 1, kind: input, shape index: {}]   ;;  %s2816_s0 = inlined_call_operand.vmem [shape: f32[8,2,4], index: 0, kind: input, shape index: {}]   ;;  %s2817_s2 = inlined_call_operand.vmem [shape: f32[48,96], index: 2, kind: input, shape index: {}]   ;;  %s2818_s3 = inlined_call_operand.vmem [shape: f32[8,3], index: 3, kind: output, shape index: {}]  }
   0x1   :  { %2227 = vmatprep.subr.bf16.mxu1 %v2452_v0  ;;  %v15_v1 = vld [vmem:[%s2815_s1 + $0x8] sm:$0xff]  ;;  %v16_v2 = vld [vmem:[%s2815_s1 + $0x10] sm:$0xff]  ;;  %v14_v3 = vld [vmem:[%s2815_s1] sm:$0xf]  ;;  %v2454_v21 = vmov 0.0   ;;  %v86_v30 = vlaneseq  ;;  %vm115_vm3 = vcmask 31744  }
   0x2   :  { %v2488_v4 = vpack.c.bf16 %v16_v2, %v15_v1  ;;  %1962 = vmatprep.subr.msk.mxu0 %vm120_vm0, %v14_v3  ;;  %v35_v5 = vld [vmem:[%s2816_s0] sm:$0x3]  ;;  %v36_v6 = vld [vmem:[%s2816_s0 + $0x2] sm:$0x3]  ;;  %v37_v7 = vld [vmem:[%s2816_s0 + $0x4] sm:$0x3]  ;;  %1975 = vmatprep.mubr.msk.f32.mxu1 %vm2453_vm2, %v2454_v21 }
   0x3   :  { %1963 = vmatpush3.msk.msra.mxu0 %vm120_vm0, %v14_v3  ;;  %v38_v8 = vld [vmem:[%s2816_s0 + $0x6] sm:$0x3]  ;;  %v44_v9 = vsel %vm43_vm1, %v35_v5, 0.0  ;;  %v45_v10 = vsel %vm43_vm1, %v36_v6, 0.0  ;;  %v39_v11 = vld [vmem:[%s2816_s0 + $0x8] sm:$0x3] }
   0x4   :  { %2229 = vmatpush3.bf16.msra.mxu1 %v2488_v4  ;;  %2233 = vmatprep.subr.bf16.mxu0 %v2452_v0  ;;  %v46_v12 = vadd.f32 %v45_v10, %v44_v9  ;;  %v47_v13 = vsel %vm43_vm1, %v37_v7, 0.0  ;;  %v17_v14 = vld [vmem:[%s2815_s1 + $0x18] sm:$0xff]  ;;  %v18_v15 = vld [vmem:[%s2815_s1 + $0x20] sm:$0xff]  ;;  %v49_v16 = vsel %vm43_vm1, %v38_v8, 0.0  ;;  %v40_v17 = vld [vmem:[%s2816_s0 + $0xa] sm:$0x3] }
   0x5   :  { %2230 = vmatprep.subr.bf16.mxu1 %v2452_v0  ;;  %v2523_v19 = vpack.c.bf16 %v18_v15, %v17_v14  ;;  %v51_v20 = vsel %vm43_vm1, %v39_v11, 0.0  ;;  %v41_v22 = vld [vmem:[%s2816_s0 + $0xc] sm:$0x3]  ;;  %v53_v24 = vsel %vm43_vm1, %v40_v17, 0.0  ;;  %v42_v25 = vld [vmem:[%s2816_s0 + $0xe] sm:$0x3] }
   0x6   :  { %v48_v18 = vadd.f32 %v47_v13, %v46_v12  ;;  %v55_v27 = vsel %vm43_vm1, %v41_v22, 0.0  ;;  %v2455_v28 = vmov 1983009808   ;;  %v57_v32 = vsel %vm43_vm1, %v42_v25, 0.0  ;;  %v19_v57 = vld [vmem:[%s2815_s1 + $0x28] sm:$0xff]  ;;  %v20_v58 = vld [vmem:[%s2815_s1 + $0x30] sm:$0xff] }
   0x7   :  { %v84_v29 = vunpack.c.l.s4 %v2455_v28  ;;  %v87_v35 = vshrl.u32 %v86_v30, 7  ;;  %v2564_v59 = vpack.c.bf16 %v20_v58, %v19_v57  ;;  %v21_v60 = vld [vmem:[%s2815_s1 + $0x38] sm:$0xff]  ;;  %v22_v61 = vld [vmem:[%s2815_s1 + $0x40] sm:$0xff]  ;;  %v23_v63 = vld [vmem:[%s2815_s1 + $0x48] sm:$0xff]  ;;  %vm281_vm4 = vcmask 523264  }
   0x8   :  { %v50_v23 = vadd.f32 %v49_v16, %v48_v18  ;;  %2232 = vmatpush3.bf16.msra.mxu1 %v2523_v19  ;;  %v2574_v62 = vpack.c.bf16 %v22_v61, %v21_v60  ;;  %v24_v1 = vld [vmem:[%s2815_s1 + $0x50] sm:$0xff]  ;;  %v25_v3 = vld [vmem:[%s2815_s1 + $0x58] sm:$0xff]  ;;  %v1804_v9 = vld [vmem:[%s2817_s2] ss:$0 sm:$0xff]  ;;  %vm203_vm5 = vcmask 261120   ;;  %vm1626_vm6 = vcmask 1041408  }
   0x9   :  { %2245 = vmatprep.subr.bf16.mxu1 %v2452_v0  ;;  %v85_v34 = vunpack.c.0.s8 %v84_v29  ;;  %v2584_v2 = vpack.c.bf16 %v24_v1, %v23_v63  ;;  %v2616_v18 = vld [vmem:[%s2817_s2 + $0x1] ss:$0 sm:$0xff]  ;;  %vm1629_vm7 = vcmask 1045504   ;;  %vm1724_vm8 = vcmask 1042432  }
   0xa   :  { %v52_v26 = vadd.f32 %v51_v20, %v50_v23  ;;  %vm1720_vm9 = vcmask 154624   ;;  %vm1798_vm10 = vcmask 23552  }
   0xb   :  { %1976 = vmatmul.mubr.f32.vlgmr.msra.gmra.mrb[0].mxu1 %v2454_v21  ;;  %v88_v38 = vsub.s32 %v85_v34, %v87_v35 }
   0xc   :  { %v54_v31 = vadd.f32 %v53_v24, %v52_v26  ;;  %2247 = vmatpush3.bf16.msra.mxu1 %v2488_v4  ;;  %2005 = vmatprep.mubr.msk.f32.mxu1 %vm2453_vm2, %v2454_v21 }
   0xd   :  { %2248 = vmatprep.subr.bf16.mxu1 %v2452_v0 }
   0xe   :  { %v56_v33 = vadd.f32 %v55_v27, %v54_v31 }
  0x10   :  { %v58_v36 = vadd.f32 %v57_v32, %v56_v33  ;;  %2250 = vmatpush3.bf16.msra.mxu1 %v2523_v19 }
  0x11   :  { %2251 = vmatprep.subr.bf16.mxu1 %v2452_v0 }
  0x12   :  { %v2546_v37 = vmul.f32 0.125, %v58_v36 }
  0x14   :  { %v61_v39 = vsub.f32 %v35_v5, %v2546_v37  ;;  %v62_v40 = vsub.f32 %v36_v6, %v2546_v37  ;;  %v63_v41 = vsub.f32 %v37_v7, %v2546_v37  ;;  %v64_v42 = vsub.f32 %v38_v8, %v2546_v37  ;;  %v26_v5 = vld [vmem:[%s2815_s1 + $0x60] sm:$0xff] }
  0x15   :  { %v65_v43 = vsub.f32 %v39_v11, %v2546_v37  ;;  %v66_v44 = vsub.f32 %v40_v17, %v2546_v37  ;;  %v67_v45 = vsub.f32 %v41_v22, %v2546_v37  ;;  %v68_v46 = vsub.f32 %v42_v25, %v2546_v37 }
  0x16   :  { %v81_v47 = vcombine.low %v61_v39, %v62_v40  ;;  %v82_v48 = vcombine.low %v63_v41, %v64_v42  ;;  %v2594_v6 = vpack.c.bf16 %v26_v5, %v25_v3 }
  0x17   :  { %v98_v49 = vcombine.low %v65_v43, %v66_v44  ;;  %v99_v50 = vcombine.low %v67_v45, %v68_v46 }
  0x18   :  { %v89_v51 = vrot.slane %v81_v47, %v88_v38  ;;  %v96_v52 = vrot.slane %v82_v48, %v88_v38 }
  0x19   :  { %v106_v53 = vrot.slane %v98_v49, %v88_v38  ;;  %v113_v54 = vrot.slane %v99_v50, %v88_v38 }
  0x1a   :  { %v97_v55 = vcombine.low %v89_v51, %v96_v52 }
  0x1b   :  { %v114_v56 = vcombine.low %v106_v53, %v113_v54 }
  0x1c   :  { %1964 = vmatprep.mubr.msk.f32.mxu0 %vm115_vm3, %v97_v55 }
  0x1d   :  { %1965 = vmatmul.mubr.msk.f32.vlgmr.msra.gmra.mrb[0].mxu0 %vm115_vm3, %v114_v56 }
  0x1e   :  { %1994 = vmatprep.mubr.msk.f32.mxu0 %vm2453_vm2, %v2454_v21  ;;  %2235 = vmatpush3.bf16.msra.mxu0 %v2564_v59 }
  0x1f   :  { %2236 = vmatprep.subr.bf16.mxu0 %v2452_v0 }
  0x22   :  { %2238 = vmatpush3.bf16.msra.mxu0 %v2574_v62 }
  0x23   :  { %2239 = vmatprep.subr.bf16.mxu0 %v2452_v0 }
  0x26   :  { %2241 = vmatpush3.bf16.msra.mxu0 %v2584_v2 }
  0x27   :  { %2242 = vmatprep.subr.bf16.mxu0 %v2452_v0 }
  0x2a   :  { %2244 = vmatpush3.bf16.msra.mxu0 %v2594_v6 }
  0x2b   :  { %2263 = vmatprep.subr.bf16.mxu0 %v2452_v0 }
  0xde   :  { %v273_v7 = vpop.f32.mrb[0].mxu1 }
  0xdf   :  { %v1977_v8 = vpop.f32.mrb[1].mxu1 }
  0xf0   :  { %v1966_v10 = vpop.f32.mrb[0].mxu0 }
  0xf1   :  { %v2601_v11 = vadd.f32 %v1966_v10, %v1804_v9  ;;  %v190_v12 = vpop.f32.mrb[1].mxu0 }
  0xf2   :  { %v2603_v13 = vadd.f32 %v1804_v9, %v190_v12 }
  0xf4   :  { %v277_v14 = vadd.f32 %v273_v7, %v2603_v13 }
  0xf6   :  { %v278_v15 = vmul.f32 0.666, %v277_v14 }
  0xf8   :  { %2388 = vtanh.f32 %v278_v15 }
 0x102   :  { %v2389_v16 = vpop.eup %2388 }
 0x103   :  { %v280_v17 = vmul.f32 1.7159, %v2389_v16 }
 0x105   :  { %1995 = vmatmul.mubr.msk.f32.vlgmr.msra.gmra.mrb[2].mxu0 %vm281_vm4, %v280_v17 }
 0x106   :  { %2265 = vmatpush3.bf16.msra.mxu0 %v2488_v4  ;;  %2035 = vmatprep.mubr.msk.f32.mxu0 %vm2453_vm2, %v2454_v21 }
 0x107   :  { %2266 = vmatprep.subr.bf16.mxu0 %v2452_v0 }
 0x10a   :  { %2268 = vmatpush3.bf16.msra.mxu0 %v2523_v19 }
 0x10b   :  { %2269 = vmatprep.subr.bf16.mxu0 %v2452_v0 }
 0x1d8   :  { %v351_v20 = vpop.f32.mrb[2].mxu0 }
 0x1d9   :  { %v352_v22 = vadd.f32 %v2616_v18, %v351_v20  ;;  %v1996_v23 = vpop.f32.mrb[3].mxu0 }
 0x1db   :  { %2390 = vtanh.f32 %v352_v22  ;;  %v1810_v24 = vmul.f32 -1.442695, %v352_v22 }
 0x1dd   :  { %2392 = vpow2.f32 %v1810_v24 }
 0x1e5   :  { %v2391_v25 = vpop.eup %2390 }
 0x1e6   :  { %369 = vrot.lane.b32.xlu0 %v2391_v25, %s2456_s29 }
 0x1e7   :  { %v2393_v26 = vpop.eup %2392 }
 0x1e8   :  { %v359_v27 = vadd.f32 1.0, %v2393_v26 }
 0x1ea   :  { %2394 = vrcp.f32 %v359_v27 }
 0x1f4   :  { %v2395_v28 = vpop.eup %2394 }
 0x1f5   :  { %v362_v29 = vsub.f32 1.0, %v2395_v28 }
 0x1f7   :  { %364 = vrot.lane.b32.xlu0 %v362_v29, %s2457_s30 }
 0x258   :  { %v370_v30 = vpop.permute.xlu0 %369 }
 0x259   :  { %v372_v31 = vmul.f32 %v2395_v28, %v370_v30 }
 0x25b   :  { %374 = vrot.lane.b32.xlu1 %v372_v31, %s2457_s30 }
 0x269   :  { %v365_v32 = vpop.permute.xlu0 %364 }
 0x26a   :  { %v367_v33 = vmul.f32 %v2391_v25, %v365_v32 }
 0x2cd   :  { %v375_v34 = vpop.permute.xlu1 %374 }
 0x2ce   :  { %v2622_v35 = vadd.f32 %v375_v34, %v367_v33 }
 0x2d0   :  { %2006 = vmatmul.mubr.msk.f32.vlgmr.msra.gmra.mrb[2].mxu1 %vm203_vm5, %v2622_v35 }
 0x2d1   :  { %2253 = vmatpush3.bf16.msra.mxu1 %v2564_v59  ;;  %2024 = vmatprep.mubr.msk.f32.mxu1 %vm2453_vm2, %v2454_v21 }
 0x2d2   :  { %2254 = vmatprep.subr.bf16.mxu1 %v2452_v0 }
 0x2d5   :  { %2256 = vmatpush3.bf16.msra.mxu1 %v2574_v62 }
 0x2d6   :  { %2257 = vmatprep.subr.bf16.mxu1 %v2452_v0 }
 0x2d9   :  { %2259 = vmatpush3.bf16.msra.mxu1 %v2584_v2 }
 0x2da   :  { %2260 = vmatprep.subr.bf16.mxu1 %v2452_v0 }
 0x2dd   :  { %2262 = vmatpush3.bf16.msra.mxu1 %v2594_v6 }
 0x2de   :  { %2281 = vmatprep.subr.bf16.mxu1 %v2452_v0 }
 0x3a3   :  { %v447_v36 = vpop.f32.mrb[2].mxu1 }
 0x3a4   :  { %v452_v38 = vrot.slane %v447_v36, 6  ;;  %v2007_v39 = vpop.f32.mrb[3].mxu1 }
 0x3a6   :  { %v454_v40 = vadd.f32 %v452_v38, %v2603_v13 }
 0x3a8   :  { %v455_v41 = vmul.f32 0.666, %v454_v40 }
 0x3aa   :  { %2396 = vtanh.f32 %v455_v41 }
 0x3b4   :  { %v2397_v42 = vpop.eup %2396 }
 0x3b5   :  { %v457_v43 = vmul.f32 1.7159, %v2397_v42 }
 0x3b7   :  { %v459_v44 = vrot.slane %v457_v43, 2 }
 0x3b9   :  { %2025 = vmatmul.mubr.msk.f32.vlgmr.msra.gmra.mrb[4].mxu1 %vm281_vm4, %v459_v44 }
 0x3ba   :  { %2283 = vmatpush3.bf16.msra.mxu1 %v2488_v4  ;;  %2065 = vmatprep.mubr.msk.f32.mxu1 %vm2453_vm2, %v2454_v21 }
 0x3bb   :  { %2284 = vmatprep.subr.bf16.mxu1 %v2452_v0 }
 0x3be   :  { %2286 = vmatpush3.bf16.msra.mxu1 %v2523_v19 }
 0x3bf   :  { %2287 = vmatprep.subr.bf16.mxu1 %v2452_v0 }
 0x48c   :  { %v528_v45 = vpop.f32.mrb[4].mxu1 }
 0x48d   :  { %v529_v46 = vadd.f32 %v2616_v18, %v528_v45  ;;  %v2026_v47 = vpop.f32.mrb[5].mxu1 }
 0x48f   :  { %2398 = vtanh.f32 %v529_v46  ;;  %v1813_v48 = vmul.f32 -1.442695, %v529_v46 }
 0x491   :  { %2400 = vpow2.f32 %v1813_v48 }
 0x499   :  { %v2399_v49 = vpop.eup %2398 }
 0x49a   :  { %546 = vrot.lane.b32.xlu1 %v2399_v49, %s2456_s29 }
 0x49b   :  { %v2401_v50 = vpop.eup %2400 }
 0x49c   :  { %v536_v51 = vadd.f32 1.0, %v2401_v50 }
 0x49e   :  { %2402 = vrcp.f32 %v536_v51 }
 0x4a8   :  { %v2403_v52 = vpop.eup %2402 }
 0x4a9   :  { %v539_v53 = vsub.f32 1.0, %v2403_v52 }
 0x4ab   :  { %541 = vrot.lane.b32.xlu0 %v539_v53, %s2457_s30 }
 0x50c   :  { %v547_v54 = vpop.permute.xlu1 %546 }
 0x50d   :  { %v549_v55 = vmul.f32 %v2403_v52, %v547_v54 }
 0x50f   :  { %551 = vrot.lane.b32.xlu1 %v549_v55, %s2457_s30 }
 0x51d   :  { %v542_v56 = vpop.permute.xlu0 %541 }
 0x51e   :  { %v544_v57 = vmul.f32 %v2399_v49, %v542_v56 }
 0x581   :  { %v552_v58 = vpop.permute.xlu1 %551 }
 0x582   :  { %v554_v60 = vadd.f32 %v552_v58, %v544_v57 }
 0x584   :  { %2036 = vmatmul.mubr.msk.f32.vlgmr.msra.gmra.mrb[4].mxu0 %vm203_vm5, %v554_v60  ;;  %v1613_v28 = vrot.slane %v554_v60, 6 }
 0x585   :  { %2271 = vmatpush3.bf16.msra.mxu0 %v2564_v59  ;;  %2054 = vmatprep.mubr.msk.f32.mxu0 %vm2453_vm2, %v2454_v21 }
 0x586   :  { %2272 = vmatprep.subr.bf16.mxu0 %v2452_v0  ;;  %v1627_v32 = vsel %vm1626_vm6, %v2622_v35, %v1613_v28 }
 0x589   :  { %2274 = vmatpush3.bf16.msra.mxu0 %v2574_v62 }
 0x58a   :  { %2275 = vmatprep.subr.bf16.mxu0 %v2452_v0 }
 0x58d   :  { %2277 = vmatpush3.bf16.msra.mxu0 %v2584_v2 }
 0x58e   :  { %2278 = vmatprep.subr.bf16.mxu0 %v2452_v0 }
 0x591   :  { %2280 = vmatpush3.bf16.msra.mxu0 %v2594_v6 }
 0x592   :  { %2299 = vmatprep.subr.bf16.mxu0 %v2452_v0 }
 0x657   :  { %v624_v61 = vpop.f32.mrb[4].mxu0 }
 0x658   :  { %v629_v63 = vrot.slane %v624_v61, 4  ;;  %v2037_v1 = vpop.f32.mrb[5].mxu0 }
 0x65a   :  { %v631_v3 = vadd.f32 %v629_v63, %v2603_v13 }
 0x65c   :  { %v632_v5 = vmul.f32 0.666, %v631_v3 }
 0x65e   :  { %2404 = vtanh.f32 %v632_v5 }
 0x668   :  { %v2405_v7 = vpop.eup %2404 }
 0x669   :  { %v634_v8 = vmul.f32 1.7159, %v2405_v7 }
 0x66b   :  { %v636_v9 = vrot.slane %v634_v8, 4 }
 0x66d   :  { %2055 = vmatmul.mubr.msk.f32.vlgmr.msra.gmra.mrb[6].mxu0 %vm281_vm4, %v636_v9 }
 0x66e   :  { %2301 = vmatpush3.bf16.msra.mxu0 %v2488_v4  ;;  %2095 = vmatprep.mubr.msk.f32.mxu0 %vm2453_vm2, %v2454_v21 }
 0x66f   :  { %2302 = vmatprep.subr.bf16.mxu0 %v2452_v0 }
 0x672   :  { %2304 = vmatpush3.bf16.msra.mxu0 %v2523_v19 }
 0x673   :  { %2305 = vmatprep.subr.bf16.mxu0 %v2452_v0 }
 0x740   :  { %v705_v10 = vpop.f32.mrb[6].mxu0 }
 0x741   :  { %v706_v12 = vadd.f32 %v2616_v18, %v705_v10  ;;  %v2056_v14 = vpop.f32.mrb[7].mxu0 }
 0x743   :  { %2406 = vtanh.f32 %v706_v12  ;;  %v1816_v15 = vmul.f32 -1.442695, %v706_v12 }
 0x745   :  { %2408 = vpow2.f32 %v1816_v15 }
 0x74d   :  { %v2407_v16 = vpop.eup %2406 }
 0x74e   :  { %723 = vrot.lane.b32.xlu0 %v2407_v16, %s2456_s29 }
 0x74f   :  { %v2409_v17 = vpop.eup %2408 }
 0x750   :  { %v713_v20 = vadd.f32 1.0, %v2409_v17 }
 0x752   :  { %2410 = vrcp.f32 %v713_v20 }
 0x75c   :  { %v2411_v22 = vpop.eup %2410 }
 0x75d   :  { %v716_v23 = vsub.f32 1.0, %v2411_v22 }
 0x75f   :  { %718 = vrot.lane.b32.xlu1 %v716_v23, %s2457_s30 }
 0x7c0   :  { %v724_v24 = vpop.permute.xlu0 %723 }
 0x7c1   :  { %v726_v25 = vmul.f32 %v2411_v22, %v724_v24 }
 0x7c3   :  { %728 = vrot.lane.b32.xlu0 %v726_v25, %s2457_s30 }
 0x7d1   :  { %v719_v26 = vpop.permute.xlu1 %718 }
 0x7d2   :  { %v721_v27 = vmul.f32 %v2407_v16, %v719_v26 }
 0x835   :  { %v729_v29 = vpop.permute.xlu0 %728 }
 0x836   :  { %v731_v30 = vadd.f32 %v729_v29, %v721_v27 }
 0x838   :  { %v1615_v31 = vrot.slane %v731_v30, 4  ;;  %2066 = vmatmul.mubr.msk.f32.vlgmr.msra.gmra.mrb[6].mxu1 %vm203_vm5, %v731_v30 }
 0x839   :  { %2289 = vmatpush3.bf16.msra.mxu1 %v2564_v59  ;;  %2084 = vmatprep.mubr.msk.f32.mxu1 %vm2453_vm2, %v2454_v21 }
 0x83a   :  { %2290 = vmatprep.subr.bf16.mxu1 %v2452_v0  ;;  %v1628_v33 = vsel %vm120_vm0, %v1627_v32, %v1615_v31 }
 0x83d   :  { %2292 = vmatpush3.bf16.msra.mxu1 %v2574_v62 }
 0x83e   :  { %2293 = vmatprep.subr.bf16.mxu1 %v2452_v0 }
 0x841   :  { %2295 = vmatpush3.bf16.msra.mxu1 %v2584_v2 }
 0x842   :  { %2296 = vmatprep.subr.bf16.mxu1 %v2452_v0 }
 0x845   :  { %2298 = vmatpush3.bf16.msra.mxu1 %v2594_v6 }
 0x846   :  { %2317 = vmatprep.subr.bf16.mxu1 %v2452_v0 }
 0x90b   :  { %v801_v34 = vpop.f32.mrb[6].mxu1 }
 0x90c   :  { %v806_v35 = vrot.slane %v801_v34, 2  ;;  %v2067_v36 = vpop.f32.mrb[7].mxu1 }
 0x90e   :  { %v808_v38 = vadd.f32 %v806_v35, %v2603_v13 }
 0x910   :  { %v809_v39 = vmul.f32 0.666, %v808_v38 }
 0x912   :  { %2412 = vtanh.f32 %v809_v39 }
 0x91c   :  { %v2413_v40 = vpop.eup %2412 }
 0x91d   :  { %v811_v41 = vmul.f32 1.7159, %v2413_v40 }
 0x91f   :  { %v813_v42 = vrot.slane %v811_v41, 6 }
 0x921   :  { %2085 = vmatmul.mubr.msk.f32.vlgmr.msra.gmra.mrb[8].mxu1 %vm281_vm4, %v813_v42 }
 0x922   :  { %2319 = vmatpush3.bf16.msra.mxu1 %v2488_v4  ;;  %2125 = vmatprep.mubr.msk.f32.mxu1 %vm2453_vm2, %v2454_v21 }
 0x923   :  { %2320 = vmatprep.subr.bf16.mxu1 %v2452_v0 }
 0x926   :  { %2322 = vmatpush3.bf16.msra.mxu1 %v2523_v19 }
 0x927   :  { %2323 = vmatprep.subr.bf16.mxu1 %v2452_v0 }
 0x9f4   :  { %v882_v43 = vpop.f32.mrb[8].mxu1 }
 0x9f5   :  { %v883_v13 = vadd.f32 %v2616_v18, %v882_v43  ;;  %v2086_v44 = vpop.f32.mrb[9].mxu1 }
 0x9f7   :  { %2414 = vtanh.f32 %v883_v13  ;;  %v1819_v45 = vmul.f32 -1.442695, %v883_v13 }
 0x9f9   :  { %2416 = vpow2.f32 %v1819_v45 }
 0xa01   :  { %v2415_v46 = vpop.eup %2414 }
 0xa02   :  { %900 = vrot.lane.b32.xlu1 %v2415_v46, %s2456_s29 }
 0xa03   :  { %v2417_v47 = vpop.eup %2416 }
 0xa04   :  { %v890_v48 = vadd.f32 1.0, %v2417_v47 }
 0xa06   :  { %2418 = vrcp.f32 %v890_v48 }
 0xa10   :  { %v2419_v49 = vpop.eup %2418 }
 0xa11   :  { %v893_v50 = vsub.f32 1.0, %v2419_v49 }
 0xa13   :  { %895 = vrot.lane.b32.xlu0 %v893_v50, %s2457_s30 }
 0xa74   :  { %v901_v51 = vpop.permute.xlu1 %900 }
 0xa75   :  { %v903_v52 = vmul.f32 %v2419_v49, %v901_v51 }
 0xa77   :  { %905 = vrot.lane.b32.xlu1 %v903_v52, %s2457_s30 }
 0xa85   :  { %v896_v53 = vpop.permute.xlu0 %895 }
 0xa86   :  { %v898_v54 = vmul.f32 %v2415_v46, %v896_v53 }
 0xae9   :  { %v906_v55 = vpop.permute.xlu1 %905 }
 0xaea   :  { %v908_v56 = vadd.f32 %v906_v55, %v898_v54 }
 0xaec   :  { %v1617_v57 = vrot.slane %v908_v56, 2  ;;  %2096 = vmatmul.mubr.msk.f32.vlgmr.msra.gmra.mrb[8].mxu0 %vm203_vm5, %v908_v56 }
 0xaed   :  { %2307 = vmatpush3.bf16.msra.mxu0 %v2564_v59  ;;  %2114 = vmatprep.mubr.msk.f32.mxu0 %vm2453_vm2, %v2454_v21 }
 0xaee   :  { %2308 = vmatprep.subr.bf16.mxu0 %v2452_v0  ;;  %v2703_v58 = vsel %vm1629_vm7, %v1628_v33, %v1617_v57 }
 0xaf1   :  { %2310 = vmatpush3.bf16.msra.mxu0 %v2574_v62 }
 0xaf2   :  { %2311 = vmatprep.subr.bf16.mxu0 %v2452_v0 }
 0xaf5   :  { %2313 = vmatpush3.bf16.msra.mxu0 %v2584_v2 }
 0xaf6   :  { %2314 = vmatprep.subr.bf16.mxu0 %v2452_v0 }
 0xaf9   :  { %2316 = vmatpush3.bf16.msra.mxu0 %v2594_v6 }
 0xafa   :  { %2335 = vmatprep.subr.bf16.mxu0 %v2452_v0 }
 0xbbf   :  { %v978_v60 = vpop.f32.mrb[8].mxu0 }
 0xbc0   :  { %v982_v61 = vadd.f32 %v978_v60, %v2601_v11  ;;  %v2097_v63 = vpop.f32.mrb[9].mxu0 }
 0xbc2   :  { %v983_v1 = vmul.f32 0.666, %v982_v61 }
 0xbc4   :  { %2420 = vtanh.f32 %v983_v1 }
 0xbce   :  { %v2421_v3 = vpop.eup %2420 }
 0xbcf   :  { %v985_v5 = vmul.f32 1.7159, %v2421_v3 }
 0xbd1   :  { %2115 = vmatmul.mubr.msk.f32.vlgmr.msra.gmra.mrb[10].mxu0 %vm281_vm4, %v985_v5 }
 0xbd2   :  { %2337 = vmatpush3.bf16.msra.mxu0 %v2488_v4  ;;  %2155 = vmatprep.mubr.msk.f32.mxu0 %vm2453_vm2, %v2454_v21 }
 0xbd3   :  { %2338 = vmatprep.subr.bf16.mxu0 %v2452_v0 }
 0xbd6   :  { %2340 = vmatpush3.bf16.msra.mxu0 %v2523_v19 }
 0xbd7   :  { %2341 = vmatprep.subr.bf16.mxu0 %v2452_v0 }
 0xca4   :  { %v1055_v7 = vpop.f32.mrb[10].mxu0 }
 0xca5   :  { %v1056_v8 = vadd.f32 %v2616_v18, %v1055_v7  ;;  %v2116_v9 = vpop.f32.mrb[11].mxu0 }
 0xca7   :  { %2422 = vtanh.f32 %v1056_v8  ;;  %v1822_v10 = vmul.f32 -1.442695, %v1056_v8 }
 0xca9   :  { %2424 = vpow2.f32 %v1822_v10 }
 0xcb1   :  { %v2423_v12 = vpop.eup %2422 }
 0xcb2   :  { %1073 = vrot.lane.b32.xlu0 %v2423_v12, %s2456_s29 }
 0xcb3   :  { %v2425_v14 = vpop.eup %2424 }
 0xcb4   :  { %v1063_v15 = vadd.f32 1.0, %v2425_v14 }
 0xcb6   :  { %2426 = vrcp.f32 %v1063_v15 }
 0xcc0   :  { %v2427_v16 = vpop.eup %2426 }
 0xcc1   :  { %v1066_v17 = vsub.f32 1.0, %v2427_v16 }
 0xcc3   :  { %1068 = vrot.lane.b32.xlu1 %v1066_v17, %s2457_s30 }
 0xd24   :  { %v1074_v20 = vpop.permute.xlu0 %1073 }
 0xd25   :  { %v1076_v22 = vmul.f32 %v2427_v16, %v1074_v20 }
 0xd27   :  { %1078 = vrot.lane.b32.xlu0 %v1076_v22, %s2457_s30 }
 0xd35   :  { %v1069_v23 = vpop.permute.xlu1 %1068 }
 0xd36   :  { %v1071_v24 = vmul.f32 %v2423_v12, %v1069_v23 }
 0xd99   :  { %v1079_v25 = vpop.permute.xlu0 %1078 }
 0xd9a   :  { %v2723_v26 = vadd.f32 %v1079_v25, %v1071_v24 }
 0xd9c   :  { %2126 = vmatmul.mubr.msk.f32.vlgmr.msra.gmra.mrb[10].mxu1 %vm203_vm5, %v2723_v26 }
 0xd9d   :  { %2325 = vmatpush3.bf16.msra.mxu1 %v2564_v59  ;;  %2144 = vmatprep.mubr.msk.f32.mxu1 %vm2453_vm2, %v2454_v21 }
 0xd9e   :  { %2326 = vmatprep.subr.bf16.mxu1 %v2452_v0 }
 0xda1   :  { %2328 = vmatpush3.bf16.msra.mxu1 %v2574_v62 }
 0xda2   :  { %2329 = vmatprep.subr.bf16.mxu1 %v2452_v0 }
 0xda5   :  { %2331 = vmatpush3.bf16.msra.mxu1 %v2584_v2 }
 0xda6   :  { %2332 = vmatprep.subr.bf16.mxu1 %v2452_v0 }
 0xda9   :  { %2334 = vmatpush3.bf16.msra.mxu1 %v2594_v6 }
 0xdaa   :  { %2353 = vmatprep.subr.bf16.mxu1 %v2452_v0 }
 0xe6f   :  { %v1151_v27 = vpop.f32.mrb[10].mxu1 }
 0xe70   :  { %v1156_v28 = vrot.slane %v1151_v27, 6  ;;  %v2127_v29 = vpop.f32.mrb[11].mxu1 }
 0xe72   :  { %v1158_v30 = vadd.f32 %v1156_v28, %v2601_v11 }
 0xe74   :  { %v1159_v31 = vmul.f32 0.666, %v1158_v30 }
 0xe76   :  { %2428 = vtanh.f32 %v1159_v31 }
 0xe80   :  { %v2429_v32 = vpop.eup %2428 }
 0xe81   :  { %v1161_v33 = vmul.f32 1.7159, %v2429_v32 }
 0xe83   :  { %v1163_v34 = vrot.slane %v1161_v33, 2  ;;  %v31_v33 = vld [vmem:[%s2817_s2 + $0x10] sm:$0xff] }
 0xe85   :  { %2145 = vmatmul.mubr.msk.f32.vlgmr.msra.gmra.mrb[12].mxu1 %vm281_vm4, %v1163_v34 }
 0xe86   :  { %2355 = vmatpush3.bf16.msra.mxu1 %v2488_v4  ;;  %2185 = vmatprep.mubr.msk.f32.mxu1 %vm2453_vm2, %v2454_v21 }
 0xe87   :  { %2356 = vmatprep.subr.bf16.mxu1 %v2452_v0 }
 0xe8a   :  { %2358 = vmatpush3.bf16.msra.mxu1 %v2523_v19 }
 0xe8b   :  { %2359 = vmatprep.subr.bf16.mxu1 %v2452_v0 }
 0xf58   :  { %v1232_v35 = vpop.f32.mrb[12].mxu1 }
 0xf59   :  { %v1233_v36 = vadd.f32 %v2616_v18, %v1232_v35  ;;  %v2146_v38 = vpop.f32.mrb[13].mxu1 }
 0xf5a   :  { %v33_v38 = vld [vmem:[%s2817_s2 + $0x20] sm:$0xff] }
 0xf5b   :  { %2430 = vtanh.f32 %v1233_v36  ;;  %v1825_v39 = vmul.f32 -1.442695, %v1233_v36  ;;  %v32_v36 = vld [vmem:[%s2817_s2 + $0x18] sm:$0xff] }
 0xf5d   :  { %2432 = vpow2.f32 %v1825_v39  ;;  %v2375_v39 = vpack.c.bf16 %v33_v38, %v32_v36 }
 0xf65   :  { %v2431_v40 = vpop.eup %2430 }
 0xf66   :  { %1250 = vrot.lane.b32.xlu1 %v2431_v40, %s2456_s29 }
 0xf67   :  { %v2433_v4 = vpop.eup %2432 }
 0xf68   :  { %v1240_v41 = vadd.f32 1.0, %v2433_v4 }
 0xf6a   :  { %2434 = vrcp.f32 %v1240_v41 }
 0xf74   :  { %v2435_v42 = vpop.eup %2434 }
 0xf75   :  { %v1243_v43 = vsub.f32 1.0, %v2435_v42 }
 0xf77   :  { %1245 = vrot.lane.b32.xlu0 %v1243_v43, %s2457_s30 }
 0xfd8   :  { %v1251_v19 = vpop.permute.xlu1 %1250 }
 0xfd9   :  { %v1253_v13 = vmul.f32 %v2435_v42, %v1251_v19 }
 0xfdb   :  { %1255 = vrot.lane.b32.xlu1 %v1253_v13, %s2457_s30 }
 0xfe9   :  { %v1246_v44 = vpop.permute.xlu0 %1245 }
 0xfea   :  { %v1248_v45 = vmul.f32 %v2431_v40, %v1246_v44 }
0x104d   :  { %v1256_v46 = vpop.permute.xlu1 %1255 }
0x104e   :  { %v1258_v47 = vadd.f32 %v1256_v46, %v1248_v45 }
0x1050   :  { %2156 = vmatmul.mubr.msk.f32.vlgmr.msra.gmra.mrb[12].mxu0 %vm203_vm5, %v1258_v47  ;;  %v1619_v12 = vrot.slane %v1258_v47, 6 }
0x1051   :  { %2343 = vmatpush3.bf16.msra.mxu0 %v2564_v59  ;;  %2174 = vmatprep.mubr.msk.f32.mxu0 %vm2453_vm2, %v2454_v21 }
0x1052   :  { %2344 = vmatprep.subr.bf16.mxu0 %v2452_v0  ;;  %v1631_v17 = vsel %vm1626_vm6, %v2723_v26, %v1619_v12 }
0x1055   :  { %2346 = vmatpush3.bf16.msra.mxu0 %v2574_v62 }
0x1056   :  { %2347 = vmatprep.subr.bf16.mxu0 %v2452_v0 }
0x1059   :  { %2349 = vmatpush3.bf16.msra.mxu0 %v2584_v2 }
0x105a   :  { %2350 = vmatprep.subr.bf16.mxu0 %v2452_v0 }
0x105d   :  { %2352 = vmatpush3.bf16.msra.mxu0 %v2594_v6 }
0x1123   :  { %v1328_v48 = vpop.f32.mrb[12].mxu0 }
0x1124   :  { %v1333_v49 = vrot.slane %v1328_v48, 4  ;;  %v2157_v50 = vpop.f32.mrb[13].mxu0 }
0x1125   :  { %v1719_v50 = vsel %vm1626_vm6, %v2546_v37, 1.0 }
0x1126   :  { %v1335_v51 = vadd.f32 %v1333_v49, %v2601_v11 }
0x1128   :  { %v1336_v52 = vmul.f32 0.666, %v1335_v51  ;;  %v34_v51 = vld [vmem:[%s2817_s2 + $0x28] sm:$0xff] }
0x112a   :  { %2436 = vtanh.f32 %v1336_v52 }
0x1134   :  { %v2437_v53 = vpop.eup %2436 }
0x1135   :  { %v1338_v54 = vmul.f32 1.7159, %v2437_v53 }
0x1137   :  { %v1340_v55 = vrot.slane %v1338_v54, 4 }
0x1139   :  { %2175 = vmatmul.mubr.msk.f32.vlgmr.msra.gmra.mrb[14].mxu0 %vm281_vm4, %v1340_v55 }
0x113a   :  { %2215 = vmatprep.mubr.msk.f32.mxu0 %vm203_vm5, %v2703_v58 }
0x120c   :  { %v1409_v56 = vpop.f32.mrb[14].mxu0 }
0x120d   :  { %v1410_v57 = vadd.f32 %v2616_v18, %v1409_v56  ;;  %v2176_v60 = vpop.f32.mrb[15].mxu0 }
0x120f   :  { %2438 = vtanh.f32 %v1410_v57  ;;  %v1828_v61 = vmul.f32 -1.442695, %v1410_v57 }
0x1211   :  { %2440 = vpow2.f32 %v1828_v61 }
0x1219   :  { %v2439_v63 = vpop.eup %2438 }
0x121a   :  { %1427 = vrot.lane.b32.xlu0 %v2439_v63, %s2456_s29 }
0x121b   :  { %v2441_v1 = vpop.eup %2440 }
0x121c   :  { %v1417_v3 = vadd.f32 1.0, %v2441_v1 }
0x121e   :  { %2442 = vrcp.f32 %v1417_v3 }
0x1228   :  { %v2443_v5 = vpop.eup %2442 }
0x1229   :  { %v1420_v7 = vsub.f32 1.0, %v2443_v5 }
0x122b   :  { %1422 = vrot.lane.b32.xlu1 %v1420_v7, %s2457_s30 }
0x128c   :  { %v1428_v8 = vpop.permute.xlu0 %1427 }
0x128d   :  { %v1430_v9 = vmul.f32 %v2443_v5, %v1428_v8 }
0x128f   :  { %1432 = vrot.lane.b32.xlu0 %v1430_v9, %s2457_s30 }
0x129d   :  { %v1423_v58 = vpop.permute.xlu1 %1422 }
0x129e   :  { %v1425_v10 = vmul.f32 %v2439_v63, %v1423_v58 }
0x1301   :  { %v1433_v14 = vpop.permute.xlu0 %1432 }
0x1302   :  { %v1435_v15 = vadd.f32 %v1433_v14, %v1425_v10 }
0x1304   :  { %v1621_v16 = vrot.slane %v1435_v15, 4  ;;  %2186 = vmatmul.mubr.msk.f32.vlgmr.msra.gmra.mrb[14].mxu1 %vm203_vm5, %v1435_v15 }
0x1305   :  { %2361 = vmatpush3.bf16.msra.mxu1 %v2564_v59  ;;  %2204 = vmatprep.mubr.msk.f32.mxu1 %vm2453_vm2, %v2454_v21 }
0x1306   :  { %v1632_v20 = vsel %vm120_vm0, %v1631_v17, %v1621_v16  ;;  %2362 = vmatprep.subr.bf16.mxu1 %v2452_v0 }
0x1309   :  { %2364 = vmatpush3.bf16.msra.mxu1 %v2574_v62 }
0x130a   :  { %2365 = vmatprep.subr.bf16.mxu1 %v2452_v0 }
0x130d   :  { %2367 = vmatpush3.bf16.msra.mxu1 %v2584_v2 }
0x130e   :  { %2368 = vmatprep.subr.bf16.mxu1 %v2452_v0 }
0x1311   :  { %2370 = vmatpush3.bf16.msra.mxu1 %v2594_v6 }
0x13d7   :  { %v1505_v22 = vpop.f32.mrb[14].mxu1 }
0x13d8   :  { %v1510_v23 = vrot.slane %v1505_v22, 2  ;;  %v2187_v59 = vpop.f32.mrb[15].mxu1 }
0x13da   :  { %v1512_v24 = vadd.f32 %v1510_v23, %v2601_v11  ;;  %v30_v11 = vld [vmem:[%s2817_s2 + $0x8] sm:$0xff] }
0x13db   :  { %v2371_v34 = vpack.c.bf16 %v31_v33, %v30_v11 }
0x13dc   :  { %v1513_v25 = vmul.f32 0.666, %v1512_v24 }
0x13dd   :  { %2372 = vmatprep.subr.bf16.mxu0 %v2371_v34 }
0x13de   :  { %2444 = vtanh.f32 %v1513_v25  ;;  %2374 = vmatpush3.bf16.msra.mxu0 %v2371_v34 }
0x13df   :  { %2376 = vmatprep.subr.bf16.mxu0 %v2375_v39 }
0x13e2   :  { %2378 = vmatpush3.bf16.msra.mxu0 %v2375_v39 }
0x13e3   :  { %2379 = vmatprep.subr.bf16.mxu0 %v2452_v0  ;;  %v1832_v0 = vld [vmem:[%s2817_s2 + $0x2] ss:$0 sm:$0xff] }
0x13e8   :  { %v2445_v26 = vpop.eup %2444 }
0x13e9   :  { %v1515_v27 = vmul.f32 1.7159, %v2445_v26 }
0x13eb   :  { %v1517_v28 = vrot.slane %v1515_v27, 6 }
0x13ed   :  { %2205 = vmatmul.mubr.msk.f32.vlgmr.msra.gmra.mrb[16].mxu1 %vm281_vm4, %v1517_v28 }
0x14c0   :  { %v1586_v62 = vpop.f32.mrb[16].mxu1 }
0x14c1   :  { %v1587_v29 = vadd.f32 %v2616_v18, %v1586_v62  ;;  %v2206_v2 = vpop.f32.mrb[17].mxu1 }
0x14c3   :  { %2446 = vtanh.f32 %v1587_v29  ;;  %v1831_v30 = vmul.f32 -1.442695, %v1587_v29 }
0x14c5   :  { %2448 = vpow2.f32 %v1831_v30 }
0x14cd   :  { %v2447_v6 = vpop.eup %2446 }
0x14ce   :  { %1604 = vrot.lane.b32.xlu1 %v2447_v6, %s2456_s29 }
0x14cf   :  { %v2449_v31 = vpop.eup %2448 }
0x14d0   :  { %v1594_v32 = vadd.f32 1.0, %v2449_v31 }
0x14d2   :  { %2450 = vrcp.f32 %v1594_v32 }
0x14dc   :  { %v2451_v18 = vpop.eup %2450 }
0x14dd   :  { %v1597_v35 = vsub.f32 1.0, %v2451_v18 }
0x14df   :  { %1599 = vrot.lane.b32.xlu0 %v1597_v35, %s2457_s30 }
0x1540   :  { %v1605_v40 = vpop.permute.xlu1 %1604 }
0x1541   :  { %v1607_v4 = vmul.f32 %v2451_v18, %v1605_v40 }
0x1543   :  { %1609 = vrot.lane.b32.xlu1 %v1607_v4, %s2457_s30 }
0x1551   :  { %v1600_v41 = vpop.permute.xlu0 %1599 }
0x1552   :  { %v1602_v42 = vmul.f32 %v2447_v6, %v1600_v41 }
0x15b5   :  { %v1610_v43 = vpop.permute.xlu1 %1609 }
0x15b6   :  { %v1612_v19 = vadd.f32 %v1610_v43, %v1602_v42 }
0x15b8   :  { %v1624_v13 = vrot.slane %v1612_v19, 2 }
0x15ba   :  { %v1633_v44 = vsel %vm1629_vm7, %v1632_v20, %v1624_v13 }
0x15bb   :  { %2216 = vmatmul.mubr.msk.f32.vlgmr.msra.gmra.mrb[16].mxu0 %vm203_vm5, %v1633_v44 }
0x15bc   :  { %2224 = vmatprep.mubr.msk.f32.mxu0 %vm2453_vm2, %v2454_v21 }
0x168e   :  { %v2217_v45 = vpop.f32.mrb[16].mxu0 }
0x168f   :  { %v1716_v46 = vadd.f32 %v2217_v45, %v1832_v0  ;;  %v1710_v47 = vpop.f32.mrb[17].mxu0 }
0x1690   :  { %v1711_v48 = vadd.f32 %v1832_v0, %v1710_v47 }
0x1692   :  { %v2380_v49 = vpack.c.bf16 %v1716_v46, %v1711_v48 }
0x1694   :  { %2381 = vmatpush3.bf16.msra.mxu0 %v2380_v49 }
0x1695   :  { %2222 = vmatprep.subr.mxu0 %v2454_v21 }
0x1698   :  { %2223 = vmatpush3.msk.msra.mxu0 %vm1724_vm8, %v1719_v50 }
0x1699   :  { %2225 = vmatmul.mubr.msk.f32.vlgmr.msra.gmra.mrb[18].mxu0 %vm1720_vm9, %v34_v51 }
0x176c   :  { %v1794_v52 = vpop.f32.mrb[18].mxu0 }
0x176d   :  { %1799 = vst.msk [vmem:[%s2818_s3] sm:$0xff] %vm1798_vm10, %v1794_v52  ;;  %v2226_v53 = vpop.f32.mrb[19].mxu0 }

</bundles_post_ra>
